<compile_context>
chip_gen: v7x
topology: tpu7x:2x2x1
jax: 0.10.0
libtpu: 0.0.40
codegen_flags: <defaults>
</compile_context>

<pallas_src>
import functools

import numpy as np
import jax
import jax.numpy as jnp
from jax.experimental import pallas as pl
from jax.experimental.pallas import tpu as pltpu


def _round_up(x: int, m: int) -> int:
    return ((x + m - 1) // m) * m


def spd_vectorize_kernel(x_ref, sel_ref, out_ref):
    # x_ref:   (TB, n*n)  flattened batch tile
    # sel_ref: (n*n, L)   one-hot selection matrix (static, resident)
    # out_ref: (TB, L)    lower-triangular entries
    a = x_ref[...]
    if a.dtype != sel_ref.dtype:
        a = a.astype(sel_ref.dtype)
    out_ref[...] = jnp.dot(
        a, sel_ref[...], preferred_element_type=jnp.float32
    ).astype(out_ref.dtype)


@functools.lru_cache(maxsize=None)
def _make_selection_matrix(n: int, dtype_name: str):
    # np.tril_indices matches torch.tril_indices(n, n) ordering
    # (row-major over the lower triangle, diagonal included).
    rows, cols = np.tril_indices(n)
    num_tril = rows.shape[0]
    flat_idx = rows * n + cols
    sel = np.zeros((n * n, num_tril), dtype=np.dtype(dtype_name))
    sel[flat_idx, np.arange(num_tril)] = 1
    return jnp.asarray(sel)


def spd_vectorize(x: jnp.ndarray) -> jnp.ndarray:
    """x: (B, n, n) -> (B, n*(n+1)//2), same dtype as x."""
    B, n, n2 = x.shape
    assert n == n2, "input must be square matrices"
    nn = n * n
    L = n * (n + 1) // 2
    itemsize = jnp.dtype(x.dtype).itemsize

    # Selection matrix in the input dtype (exact: entries are 0/1). Keeps the
    # MXU on its native bf16 path for bf16 inputs. Other dtypes go through the
    # f32 path (exact for |x| < 2^24).
    if x.dtype in (jnp.bfloat16, jnp.float32):
        sel_dtype = x.dtype
    else:
        sel_dtype = jnp.float32
    sel = _make_selection_matrix(n, jnp.dtype(sel_dtype).name)

    # Batch tiling: sublane-aligned (8 f32 / 16 bf16 / 32 int8), as large as
    # possible up to 512 rows while keeping the x tile within ~2 MiB of VMEM
    # (double-buffered by the pipeline -> ~4 MiB).
    sub = 8 * max(1, 4 // itemsize)
    max_tb = max(sub, ((2 * 1024 * 1024) // (nn * itemsize)) // sub * sub)
    TB = min(512, _round_up(B, sub), max_tb)
    grid = (pl.cdiv(B, TB),)

    # Free reshape (contiguous) — done in the wrapper so the kernel never
    # reshapes across (8,128) tile boundaries in VMEM.
    x_flat = x.reshape(B, nn)

    cost = pl.CostEstimate(
        flops=2 * B * nn * L,
        transcendentals=0,
        bytes_accessed=(
            B * nn * itemsize
            + B * L * itemsize
            + nn * L * jnp.dtype(sel_dtype).itemsize
        ),
    )

    out = pl.pallas_call(
        spd_vectorize_kernel,
        out_shape=jax.ShapeDtypeStruct((B, L), x.dtype),
        grid=grid,
        in_specs=[
            pl.BlockSpec((TB, nn), lambda b: (b, 0)),   # batch tile
            pl.BlockSpec((nn, L), lambda b: (0, 0)),    # sel, resident across grid
        ],
        out_specs=pl.BlockSpec((TB, L), lambda b: (b, 0)),
        compiler_params=pltpu.CompilerParams(
            dimension_semantics=("parallel",),
        ),
        cost_estimate=cost,
    )(x_flat, sel)

    return out


if __name__ == "__main__":
    B, n = 2, 16  # input_features = 16  ->  L = 16*17/2 = 136
    key = jax.random.PRNGKey(0)
    a = jax.random.normal(key, (B, n, n), dtype=jnp.float32)
    # Make the inputs SPD (symmetric positive definite) for semantic fidelity.
    x = jnp.einsum("bij,bkj->bik", a, a) + n * jnp.eye(n, dtype=jnp.float32)[None]

    out = spd_vectorize(x)
    out = jax.block_until_ready(out)

    # Reference: same semantics as input[:, row_idx, col_idx] in PyTorch.
    rows, cols = np.tril_indices(n)
    ref = x[:, rows, cols]

    assert out.shape == (B, n * (n + 1) // 2), out.shape
    assert out.dtype == x.dtype
    np.testing.assert_allclose(np.asarray(out), np.asarray(ref), rtol=0, atol=0)
    print("KERNEL_OK")
</pallas_src>

<mosaic_0001>
module attributes {stable_mosaic.version = 11 : i64} {
  func.func @spd_vectorize_kernel(%arg0: i32, %arg1: memref<8x256xf32, #tpu.memory_space<vmem>>, %arg2: memref<256x136xf32, #tpu.memory_space<vmem>>, %arg3: memref<8x136xf32, #tpu.memory_space<vmem>>) attributes {dimension_semantics = [#tpu.dimension_semantics<parallel>], iteration_bounds = array<i64: 1>, scalar_prefetch = 0 : i64, scratch_operands = 0 : i64, tpu.core_type = #tpu.core_type<tc>, window_params = [{transform_indices = @transform_0, window_bounds = array<i64: 8, 256>}, {pipeline_mode = #tpu.pipeline_mode<synchronous>, transform_indices = @transform_1, window_bounds = array<i64: 256, 136>}, {transform_indices = @transform_2, window_bounds = array<i64: 8, 136>}]} {
    %c0 = arith.constant 0 : index
    %c0_0 = arith.constant 0 : index
    %0 = vector.load %arg1[%c0, %c0_0] : memref<8x256xf32, #tpu.memory_space<vmem>>, vector<8x256xf32>
    %c0_1 = arith.constant 0 : index
    %c0_2 = arith.constant 0 : index
    %1 = vector.load %arg2[%c0_1, %c0_2] : memref<256x136xf32, #tpu.memory_space<vmem>>, vector<256x136xf32>
    %cst = arith.constant dense<0.000000e+00> : vector<8x136xf32>
    %2 = tpu.matmul %0, %1, %cst {dimension_numbers = #tpu.dot_dimension_numbers<[1], [0], [0], [1], [0, 0, 1, 1], [], []>} : vector<8x256xf32>, vector<256x136xf32>, vector<8x136xf32> -> vector<8x136xf32>
    %c0_3 = arith.constant 0 : index
    %c0_4 = arith.constant 0 : index
    %3 = vector.load %arg3[%c0_3, %c0_4] : memref<8x136xf32, #tpu.memory_space<vmem>>, vector<8x136xf32>
    tpu.vector_store %arg3[%c0_3, %c0_4], %2 {strides = array<i32>} : memref<8x136xf32, #tpu.memory_space<vmem>>, vector<8x136xf32>,
    return
  }
  func.func @transform_0(%arg0: i32) -> (i32, i32) {
    %c0_i32 = arith.constant 0 : i32
    %c0_i32_0 = arith.constant 0 : i32
    return %arg0, %c0_i32 : i32, i32
  }
  func.func @transform_1(%arg0: i32) -> (i32, i32) {
    %c0_i32 = arith.constant 0 : i32
    %c0_i32_0 = arith.constant 0 : i32
    %c0_i32_1 = arith.constant 0 : i32
    return %c0_i32, %c0_i32_0 : i32, i32
  }
  func.func @transform_2(%arg0: i32) -> (i32, i32) {
    %c0_i32 = arith.constant 0 : i32
    %c0_i32_0 = arith.constant 0 : i32
    return %arg0, %c0_i32 : i32, i32
  }
}

</mosaic_0001>

<bundles_post_ra>
// kernel: tpu_custom_call.1
= control target key start
LH: loop header
LB: loop body
LE: loop exit
PB: predicated region body
PF: predicated region fallthrough
CT: control target
= control target key end

     0   :  { %7 = vsyncpa [#allocation3], 0  ;;  %v318_v29 = vmov 1983009808   ;;  %v89_v31 = vlaneseq  ;;  %vm199_vm0 = vcmask 1041408   ;;  %vm200_vm1 = vcmask 60418   ;;  %s559_s0 = inlined_call_operand.vmem [shape: f32[2,256], index: 0, kind: input, shape index: {}]   ;;  %s560_s1 = inlined_call_operand.vmem [shape: f32[256,136], index: 1, kind: input, shape index: {}]   ;;  %s561_s2 = inlined_call_operand.hbm [shape: f32[2,136], index: 2, kind: output, shape index: {}]  }
   0x1   :  { %v17_v0 = vld [vmem:[%s560_s1 + $0x8] sm:$0xff]  ;;  %v19_v1 = vld [vmem:[%s560_s1 + $0x18] sm:$0xff]  ;;  %v16_v3 = vld [vmem:[%s560_s1] sm:$0xff]  ;;  %v87_v30 = vunpack.c.l.s4 %v318_v29 }
   0x2   :  { %v222_v2 = vpack.c.bf16 %v19_v1, %v17_v0  ;;  %v18_v4 = vld [vmem:[%s560_s1 + $0x10] sm:$0xff]  ;;  %v21_v5 = vld [vmem:[%s560_s1 + $0x28] sm:$0xff]  ;;  %v23_v7 = vld [vmem:[%s560_s1 + $0x38] sm:$0xff]  ;;  %v90_v39 = vshrl.u32 %v89_v31, 7 }
   0x3   :  { %v224_v6 = vpack.c.bf16 %v18_v4, %v16_v3  ;;  %v20_v8 = vld [vmem:[%s560_s1 + $0x20] sm:$0xff]  ;;  %v22_v9 = vld [vmem:[%s560_s1 + $0x30] sm:$0xff]  ;;  %v226_v10 = vpack.c.bf16 %v23_v7, %v21_v5  ;;  %v25_v11 = vld [vmem:[%s560_s1 + $0x48] sm:$0xff]  ;;  %v88_v38 = vunpack.c.0.s8 %v87_v30 }
   0x4   :  { %223 = vmatprep.subr.bf16.mxu0 %v222_v2  ;;  %v27_v12 = vld [vmem:[%s560_s1 + $0x58] sm:$0xff]  ;;  %v228_v13 = vpack.c.bf16 %v22_v9, %v20_v8  ;;  %v24_v15 = vld [vmem:[%s560_s1 + $0x40] sm:$0xff]  ;;  %v26_v16 = vld [vmem:[%s560_s1 + $0x50] sm:$0xff] }
   0x5   :  { %225 = vmatpush1.bf16.msra.mxu0 %v224_v6  ;;  %v230_v14 = vpack.c.bf16 %v27_v12, %v25_v11  ;;  %v29_v17 = vld [vmem:[%s560_s1 + $0x68] sm:$0xff]  ;;  %v31_v18 = vld [vmem:[%s560_s1 + $0x78] sm:$0xff]  ;;  %v232_v19 = vpack.c.bf16 %v26_v16, %v24_v15  ;;  %v28_v21 = vld [vmem:[%s560_s1 + $0x60] sm:$0xff]  ;;  %v427_v48 = vsub.s32 %v88_v38, %v90_v39 }
   0x6   :  { %227 = vmatprep.subr.bf16.mxu0 %v226_v10  ;;  %v234_v20 = vpack.c.bf16 %v31_v18, %v29_v17  ;;  %v30_v22 = vld [vmem:[%s560_s1 + $0x70] sm:$0xff]  ;;  %v33_v23 = vld [vmem:[%s560_s1 + $0x88] sm:$0xff]  ;;  %v35_v24 = vld [vmem:[%s560_s1 + $0x98] sm:$0xff] }
   0x7   :  { %v236_v25 = vpack.c.bf16 %v30_v22, %v28_v21  ;;  %v238_v26 = vpack.c.bf16 %v35_v24, %v33_v23  ;;  %v32_v27 = vld [vmem:[%s560_s1 + $0x80] sm:$0xff]  ;;  %v34_v28 = vld [vmem:[%s560_s1 + $0x90] sm:$0xff]  ;;  %v37_v32 = vld [vmem:[%s560_s1 + $0xa8] sm:$0xff] }
   0x8   :  { %v39_v33 = vld [vmem:[%s560_s1 + $0xb8] sm:$0xff]  ;;  %v240_v34 = vpack.c.bf16 %v34_v28, %v32_v27  ;;  %v36_v36 = vld [vmem:[%s560_s1 + $0xa0] sm:$0xff]  ;;  %v38_v37 = vld [vmem:[%s560_s1 + $0xb0] sm:$0xff] }
   0x9   :  { %229 = vmatpush1.bf16.msra.mxu0 %v228_v13  ;;  %v242_v35 = vpack.c.bf16 %v39_v33, %v37_v32  ;;  %v41_v40 = vld [vmem:[%s560_s1 + $0xc8] sm:$0xff]  ;;  %v43_v41 = vld [vmem:[%s560_s1 + $0xd8] sm:$0xff]  ;;  %v244_v42 = vpack.c.bf16 %v38_v37, %v36_v36  ;;  %v40_v43 = vld [vmem:[%s560_s1 + $0xc0] sm:$0xff] }
   0xa   :  { %231 = vmatprep.subr.bf16.mxu0 %v230_v14  ;;  %v42_v44 = vld [vmem:[%s560_s1 + $0xd0] sm:$0xff]  ;;  %v246_v45 = vpack.c.bf16 %v43_v41, %v41_v40  ;;  %v45_v46 = vld [vmem:[%s560_s1 + $0xe8] sm:$0xff]  ;;  %v47_v47 = vld [vmem:[%s560_s1 + $0xf8] sm:$0xff] }
   0xb   :  { %v432_v49 = vld.sshfl [vmem:[%s559_s0] sm:$0xff pattern:$0x76325410]  ;;  %v437_v50 = vld.sshfl [vmem:[%s559_s0 + $0x8] sm:$0xff pattern:$0x76325410]  ;;  %v248_v51 = vpack.c.bf16 %v42_v44, %v40_v43  ;;  %v250_v52 = vpack.c.bf16 %v47_v47, %v45_v46  ;;  %vm201_vm2 = vmor %vm200_vm1, %vm199_vm0 }
   0xc   :  { %v44_v53 = vld [vmem:[%s560_s1 + $0xe0] sm:$0xff]  ;;  %v46_v54 = vld [vmem:[%s560_s1 + $0xf0] sm:$0xff]  ;;  %v49_v55 = vld [vmem:[%s560_s1 + $0x108] sm:$0xff]  ;;  %v101_v57 = vcombine.high %v432_v49, %v437_v50  ;;  %v100_v41 = vcombine.low %v432_v49, %v437_v50 }
   0xd   :  { %233 = vmatpush1.bf16.msra.mxu0 %v232_v19  ;;  %v51_v56 = vld [vmem:[%s560_s1 + $0x118] sm:$0xff]  ;;  %v252_v58 = vpack.c.bf16 %v46_v54, %v44_v53  ;;  %v48_v60 = vld [vmem:[%s560_s1 + $0x100] sm:$0xff]  ;;  %v50_v61 = vld [vmem:[%s560_s1 + $0x110] sm:$0xff] }
   0xe   :  { %235 = vmatprep.subr.bf16.mxu0 %v234_v20  ;;  %v254_v59 = vpack.c.bf16 %v51_v56, %v49_v55  ;;  %168 = vmatprep.mubr.f32.mxu0 %v101_v57  ;;  %v53_v62 = vld [vmem:[%s560_s1 + $0x128] sm:$0xff]  ;;  %v55_v63 = vld [vmem:[%s560_s1 + $0x138] sm:$0xff]  ;;  %v256_v0 = vpack.c.bf16 %v50_v61, %v48_v60  ;;  %v52_v2 = vld [vmem:[%s560_s1 + $0x120] sm:$0xff] }
   0xf   :  { %v258_v1 = vpack.c.bf16 %v55_v63, %v53_v62  ;;  %v54_v3 = vld [vmem:[%s560_s1 + $0x130] sm:$0xff]  ;;  %v57_v4 = vld [vmem:[%s560_s1 + $0x148] sm:$0xff]  ;;  %v59_v5 = vld [vmem:[%s560_s1 + $0x158] sm:$0xff] }
  0x10   :  { %v260_v6 = vpack.c.bf16 %v54_v3, %v52_v2  ;;  %v262_v7 = vpack.c.bf16 %v59_v5, %v57_v4  ;;  %v56_v8 = vld [vmem:[%s560_s1 + $0x140] sm:$0xff]  ;;  %v58_v9 = vld [vmem:[%s560_s1 + $0x150] sm:$0xff]  ;;  %v61_v10 = vld [vmem:[%s560_s1 + $0x168] sm:$0xff] }
  0x11   :  { %237 = vmatpush1.bf16.msra.mxu0 %v236_v25  ;;  %v63_v11 = vld [vmem:[%s560_s1 + $0x178] sm:$0xff]  ;;  %v264_v12 = vpack.c.bf16 %v58_v9, %v56_v8  ;;  %v60_v14 = vld [vmem:[%s560_s1 + $0x160] sm:$0xff]  ;;  %v62_v15 = vld [vmem:[%s560_s1 + $0x170] sm:$0xff] }
  0x12   :  { %239 = vmatprep.subr.bf16.mxu0 %v238_v26  ;;  %v266_v13 = vpack.c.bf16 %v63_v11, %v61_v10  ;;  %v65_v16 = vld [vmem:[%s560_s1 + $0x188] sm:$0xff]  ;;  %v67_v17 = vld [vmem:[%s560_s1 + $0x198] sm:$0xff]  ;;  %v268_v18 = vpack.c.bf16 %v62_v15, %v60_v14  ;;  %v64_v20 = vld [vmem:[%s560_s1 + $0x180] sm:$0xff] }
  0x13   :  { %v270_v19 = vpack.c.bf16 %v67_v17, %v65_v16  ;;  %v66_v21 = vld [vmem:[%s560_s1 + $0x190] sm:$0xff]  ;;  %v69_v22 = vld [vmem:[%s560_s1 + $0x1a8] sm:$0xff]  ;;  %v71_v23 = vld [vmem:[%s560_s1 + $0x1b8] sm:$0xff] }
  0x14   :  { %v272_v24 = vpack.c.bf16 %v66_v21, %v64_v20  ;;  %v274_v25 = vpack.c.bf16 %v71_v23, %v69_v22  ;;  %v68_v26 = vld [vmem:[%s560_s1 + $0x1a0] sm:$0xff]  ;;  %v70_v27 = vld [vmem:[%s560_s1 + $0x1b0] sm:$0xff]  ;;  %v73_v28 = vld [vmem:[%s560_s1 + $0x1c8] sm:$0xff] }
  0x15   :  { %241 = vmatpush1.bf16.msra.mxu0 %v240_v34  ;;  %v75_v29 = vld [vmem:[%s560_s1 + $0x1d8] sm:$0xff]  ;;  %v276_v30 = vpack.c.bf16 %v70_v27, %v68_v26  ;;  %v72_v32 = vld [vmem:[%s560_s1 + $0x1c0] sm:$0xff]  ;;  %v74_v33 = vld [vmem:[%s560_s1 + $0x1d0] sm:$0xff] }
  0x16   :  { %243 = vmatprep.subr.bf16.mxu0 %v242_v35  ;;  %v278_v31 = vpack.c.bf16 %v75_v29, %v73_v28  ;;  %v77_v34 = vld [vmem:[%s560_s1 + $0x1e8] sm:$0xff]  ;;  %v79_v35 = vld [vmem:[%s560_s1 + $0x1f8] sm:$0xff]  ;;  %v280_v36 = vpack.c.bf16 %v74_v33, %v72_v32  ;;  %v76_v38 = vld [vmem:[%s560_s1 + $0x1e0] sm:$0xff] }
  0x17   :  { %v282_v37 = vpack.c.bf16 %v79_v35, %v77_v34  ;;  %v78_v39 = vld [vmem:[%s560_s1 + $0x1f0] sm:$0xff] }
  0x18   :  { %v284_v40 = vpack.c.bf16 %v78_v39, %v76_v38 }
  0x19   :  { %245 = vmatpush1.bf16.msra.mxu0 %v244_v42 }
  0x1a   :  { %247 = vmatprep.subr.bf16.mxu0 %v246_v45 }
  0x1d   :  { %249 = vmatpush1.bf16.msra.mxu0 %v248_v51 }
  0x1e   :  { %251 = vmatprep.subr.bf16.mxu0 %v250_v52 }
  0x21   :  { %253 = vmatpush1.bf16.msra.mxu0 %v252_v58 }
  0x22   :  { %255 = vmatprep.subr.bf16.mxu0 %v254_v59 }
  0x25   :  { %257 = vmatpush1.bf16.msra.mxu0 %v256_v0 }
  0x26   :  { %259 = vmatprep.subr.bf16.mxu0 %v258_v1 }
  0x29   :  { %261 = vmatpush1.bf16.msra.mxu0 %v260_v6 }
  0x2a   :  { %263 = vmatprep.subr.bf16.mxu0 %v262_v7 }
  0x2d   :  { %265 = vmatpush1.bf16.msra.mxu0 %v264_v12 }
  0x2e   :  { %267 = vmatprep.subr.bf16.mxu0 %v266_v13 }
  0x31   :  { %269 = vmatpush1.bf16.msra.mxu0 %v268_v18 }
  0x32   :  { %271 = vmatprep.subr.bf16.mxu0 %v270_v19 }
  0x35   :  { %273 = vmatpush1.bf16.msra.mxu0 %v272_v24 }
  0x36   :  { %275 = vmatprep.subr.bf16.mxu0 %v274_v25 }
  0x39   :  { %277 = vmatpush1.bf16.msra.mxu0 %v276_v30 }
  0x3a   :  { %279 = vmatprep.subr.bf16.mxu0 %v278_v31 }
  0x3d   :  { %281 = vmatpush1.bf16.msra.mxu0 %v280_v36 }
  0x3e   :  { %283 = vmatprep.subr.bf16.mxu0 %v282_v37 }
  0x41   :  { %285 = vmatpush1.bf16.msra.mxu0 %v284_v40 }
  0x44   :  { %169 = vmatmul.mubr.f32.vlgmr.msra.gmra.mrb[0].mxu0 %v100_v41 }
 0x117   :  { %v170_v42 = vpop.f32.mrb[0].mxu0 }
 0x118   :  { %v172_v43 = vpop.f32.mrb[1].mxu0 }
 0x119   :  { %v177_v44 = vcombine.low %v170_v42, %v172_v43  ;;  %v178_v45 = vcombine.high %v170_v42, %v172_v43 }
 0x11b   :  { %v185_v46 = vrot.slane %v177_v44, %v427_v48  ;;  %v192_v47 = vrot.slane %v178_v45, %v427_v48 }
 0x11d   :  { %v193_v51 = vcombine.high %v185_v46, %v185_v46  ;;  %v194_v52 = vcombine.high %v192_v47, %v192_v47  ;;  %202 = vst.msk [vmem:[#allocation2] sm:$0xf] %vm201_vm2, %v185_v46  ;;  %204 = vst.msk [vmem:[#allocation2 + $0x8] sm:$0xf] %vm201_vm2, %v192_v47 }
 0x11f   :  { %203 = vst.msk [vmem:[#allocation2 + $0x4] sm:$0xf] %vm201_vm2, %v193_v51  ;;  %205 = vst.msk [vmem:[#allocation2 + $0xc] sm:$0xf] %vm201_vm2, %v194_v52 }
 0x120   :  { %210 = vsyncadd [#allocation3], 192  ;;  %s319_s1 = smov [#allocation2]  }
 0x121   :  { %s211_s26 = sshll.u32 %s319_s1, 4  ;;  %s212_s26 = int_to_ptr.vmem [resolvable:$true] %s211_s26 }
 0x122   :  { %s294_s27 = scalar_lea.vmem %s212_s26, 64  ;;  %s298_s28 = scalar_lea.vmem %s212_s26, 256 }
 0x123   :  { %p295_p0 = scmp.ne.s32.totalorder %s212_s26, %s294_s27  ;;  %p299_p1 = scmp.lt.s32.totalorder %s212_s26, %s212_s26 }
 0x124   :  { %p300_p2 = scmp.lt.s32.totalorder %s298_s28, %s294_s27 }
 0x126   :  { %p301_p3 = por %p300_p2, %p299_p1 }
 0x128   :  { %p302_p4 = pnand %p301_p3, %p295_p0 }
 0x12a   :  { %305 = shalt.err (!%p302_p4)
}
 0x12b   :  { %s306_s3 = scalar_lea.hbm %s561_s2, 64 }
 0x12c   :  { %p307_p5 = scmp.ne.s32.totalorder %s561_s2, %s306_s3  ;;  %p310_p6 = scmp.lt.u32.totalorder %s306_s3, %s561_s2 }
 0x12e   :  { %p312_p7 = pnand %p310_p6, %p307_p5 }
 0x130   :  { %315 = shalt.err (!%p312_p7)
}
 0x131   :  { %s320_s8 = smov 64   ;;  %s321_s9 = smov 4  }
 0x132   :  { %217 = dma.vmem_to_hbm [thread:$0]  %s212_s26, 64, %s561_s2, [#allocation3], %s320_s8, %s320_s8, %s321_s9  }
 0x133   :  { %316 = dma.done.wait [#allocation3], 256  }
 0x134   :  { %317 = vsyncadd [#allocation3], 4294967040 }
 0x135   :  { %221 = vsyncpa [#allocation3], 1 }

</bundles_post_ra>
